<compile_context>
chip_gen: v7x
topology: tpu7x:2x2x1
jax: 0.10.0
libtpu: 0.0.40
codegen_flags: <defaults>
</compile_context>

<pallas_src>
import functools

import jax
import jax.numpy as jnp
from jax.experimental import pallas as pl
from jax.experimental.pallas import tpu as pltpu

LANE = 128


def _join_head_kernel(seq_ref, pooled_ref, wi_ref, bi_ref, ws_ref, bs_ref,
                      intent_ref, slot_ref):
    seq = seq_ref[...]                                  # (TB, S, H)
    tb, s, h = seq.shape
    pooled = pooled_ref[...]                            # (TB, H)

    # joined = mean(sequence_output, axis=1) + pooled_output      (per batch row)
    mean_seq = jnp.mean(seq.astype(jnp.float32), axis=1)           # (TB, H)
    joined = mean_seq + pooled.astype(jnp.float32)                 # (TB, H)

    # intent_classifier: Dropout (identity in eval) -> Linear(H, num_intents)
    # One (TB, H) @ (H, 128) matmul per grid step (lane-dense padded N).
    intent = jnp.dot(joined, wi_ref[...],
                     preferred_element_type=jnp.float32) + bi_ref[...]
    intent_ref[...] = intent.astype(intent_ref.dtype)

    # slot_detection: Dropout (identity in eval) -> Linear(H, num_tags)
    # Single (TB*S, H) @ (H, 128) matmul for the whole tile; dense (TB*S, 128) store.
    seq_flat = seq.reshape(tb * s, h)                              # (TB*S, H)
    slot = jnp.dot(seq_flat, ws_ref[...],
                   preferred_element_type=jnp.float32) + bs_ref[...]
    slot_ref[...] = slot.astype(slot_ref.dtype)

    # TODO(synk): CRF decoding / forward_train losses are not part of forward(); not implemented.


def _pick_batch_tile(B, S, H, itemsize, vmem_budget_bytes=8 << 20):
    """Largest batch tile that (a) divides B, (b) satisfies the sublane tiling
    rule on 2-D (TB, H) blocks (TB % 8 == 0 or TB == B), (c) fits a conservative
    double-buffered VMEM budget, and (d) leaves >= 2 grid steps when possible
    (so both v7x TensorCores get work)."""
    valid = [tb for tb in range(1, B + 1)
             if B % tb == 0 and (tb % 8 == 0 or tb == B)]
    fitting = [tb for tb in valid if 2 * tb * S * H * itemsize <= vmem_budget_bytes]
    pool = fitting if fitting else valid[:1]
    multi = [tb for tb in pool if B // tb >= 2]
    return max(multi) if multi else max(pool)


def _pad_cols(x, n_pad):
    n = x.shape[-1]
    if n == n_pad:
        return x
    pad = [(0, 0)] * (x.ndim - 1) + [(0, n_pad - n)]
    return jnp.pad(x, pad)


@functools.partial(jax.jit, static_argnames=("batch_tile",))
def model_join_forward(sequence_output, pooled_output,
                       w_intent, b_intent, w_slot, b_slot, *, batch_tile=None):
    B, S, H = sequence_output.shape
    num_intents = w_intent.shape[1]
    num_tags = w_slot.shape[1]

    # Lane-dense (multiple-of-128) output columns: zero-pad weights/biases,
    # slice the real columns back after the kernel.
    ni_pad = pl.cdiv(num_intents, LANE) * LANE
    ns_pad = pl.cdiv(num_tags, LANE) * LANE
    wi = _pad_cols(w_intent, ni_pad)
    bi = _pad_cols(b_intent.reshape(1, num_intents), ni_pad)
    ws = _pad_cols(w_slot, ns_pad)
    bs = _pad_cols(b_slot.reshape(1, num_tags), ns_pad)

    if batch_tile is None:
        batch_tile = _pick_batch_tile(B, S, H, sequence_output.dtype.itemsize)
    TB = batch_tile
    assert B % TB == 0, "batch_tile must divide the batch size"
    grid = (B // TB,)

    intent_pad, slot_pad = pl.pallas_call(
        _join_head_kernel,
        out_shape=(
            jax.ShapeDtypeStruct((B, ni_pad), jnp.float32),
            jax.ShapeDtypeStruct((B * S, ns_pad), jnp.float32),   # flattened, lane-dense
        ),
        grid_spec=pltpu.PrefetchScalarGridSpec(
            num_scalar_prefetch=0,
            grid=grid,
            in_specs=[
                pl.BlockSpec((TB, S, H), lambda b: (b, 0, 0)),     # sequence tile
                pl.BlockSpec((TB, H), lambda b: (b, 0)),           # pooled tile
                pl.BlockSpec((H, ni_pad), lambda b: (0, 0)),       # intent weight (shared)
                pl.BlockSpec((1, ni_pad), lambda b: (0, 0)),       # intent bias (shared)
                pl.BlockSpec((H, ns_pad), lambda b: (0, 0)),       # slot weight (shared)
                pl.BlockSpec((1, ns_pad), lambda b: (0, 0)),       # slot bias (shared)
            ],
            out_specs=[
                pl.BlockSpec((TB, ni_pad), lambda b: (b, 0)),
                pl.BlockSpec((TB * S, ns_pad), lambda b: (b, 0)),
            ],
        ),
        compiler_params=pltpu.CompilerParams(
            dimension_semantics=("parallel",)),
    )(sequence_output, pooled_output, wi, bi, ws, bs)

    intent_logits = intent_pad[:, :num_intents]
    slot_logits = slot_pad.reshape(B, S, ns_pad)[:, :, :num_tags]
    return intent_logits, slot_logits


def _reference(sequence_output, pooled_output, w_intent, b_intent, w_slot, b_slot):
    joined = jnp.mean(sequence_output, axis=1) + pooled_output
    intent = joined @ w_intent + b_intent
    slot = jnp.einsum("bsh,ht->bst", sequence_output, w_slot) + b_slot
    return intent, slot


if __name__ == "__main__":
    # Small, BERT-like shapes (real deployments: S=512, H=768).
    B, S, H = 16, 8, 32
    NUM_INTENTS, NUM_TAGS = 8, 16

    key = jax.random.PRNGKey(0)
    k_seq, k_pool, k_wi, k_bi, k_ws, k_bs = jax.random.split(key, 6)

    sequence_output = jax.random.normal(k_seq, (B, S, H), dtype=jnp.float32)
    pooled_output = jax.random.normal(k_pool, (B, H), dtype=jnp.float32)

    # Deterministic synthetic parameters (PyTorch nn.Linear weight transposed).
    w_intent = 0.02 * jax.random.normal(k_wi, (H, NUM_INTENTS), dtype=jnp.float32)
    b_intent = 0.01 * jax.random.normal(k_bi, (NUM_INTENTS,), dtype=jnp.float32)
    w_slot = 0.02 * jax.random.normal(k_ws, (H, NUM_TAGS), dtype=jnp.float32)
    b_slot = 0.01 * jax.random.normal(k_bs, (NUM_TAGS,), dtype=jnp.float32)

    intent_logits, slot_logits = model_join_forward(
        sequence_output, pooled_output, w_intent, b_intent, w_slot, b_slot)
    jax.block_until_ready((intent_logits, slot_logits))

    # Correctness check against a pure-JAX reference.
    ref_intent, ref_slot = _reference(
        sequence_output, pooled_output, w_intent, b_intent, w_slot, b_slot)
    assert intent_logits.shape == (B, NUM_INTENTS)
    assert slot_logits.shape == (B, S, NUM_TAGS)
    assert jnp.allclose(intent_logits, ref_intent, atol=1e-5, rtol=1e-5)
    assert jnp.allclose(slot_logits, ref_slot, atol=1e-5, rtol=1e-5)

    print("KERNEL_OK")
</pallas_src>

<mosaic_0001>
module attributes {stable_mosaic.version = 11 : i64} {
  func.func @_join_head_kernel(%arg0: i32, %arg1: memref<8x8x32xf32, #tpu.memory_space<vmem>>, %arg2: memref<8x32xf32, #tpu.memory_space<vmem>>, %arg3: memref<32x128xf32, #tpu.memory_space<vmem>>, %arg4: memref<1x128xf32, #tpu.memory_space<vmem>>, %arg5: memref<32x128xf32, #tpu.memory_space<vmem>>, %arg6: memref<1x128xf32, #tpu.memory_space<vmem>>, %arg7: memref<8x128xf32, #tpu.memory_space<vmem>>, %arg8: memref<64x128xf32, #tpu.memory_space<vmem>>) attributes {dimension_semantics = [#tpu.dimension_semantics<parallel>], iteration_bounds = array<i64: 2>, scalar_prefetch = 0 : i64, scratch_operands = 0 : i64, tpu.core_type = #tpu.core_type<tc>, window_params = [{transform_indices = @transform_0, window_bounds = array<i64: 8, 8, 32>}, {transform_indices = @transform_1, window_bounds = array<i64: 8, 32>}, {pipeline_mode = #tpu.pipeline_mode<synchronous>, transform_indices = @transform_2, window_bounds = array<i64: 32, 128>}, {pipeline_mode = #tpu.pipeline_mode<synchronous>, transform_indices = @transform_3, window_bounds = array<i64: 1, 128>}, {pipeline_mode = #tpu.pipeline_mode<synchronous>, transform_indices = @transform_4, window_bounds = array<i64: 32, 128>}, {pipeline_mode = #tpu.pipeline_mode<synchronous>, transform_indices = @transform_5, window_bounds = array<i64: 1, 128>}, {transform_indices = @transform_6, window_bounds = array<i64: 8, 128>}, {transform_indices = @transform_7, window_bounds = array<i64: 64, 128>}]} {
    %c0 = arith.constant 0 : index
    %c0_0 = arith.constant 0 : index
    %c0_1 = arith.constant 0 : index
    %0 = vector.load %arg1[%c0, %c0_0, %c0_1] : memref<8x8x32xf32, #tpu.memory_space<vmem>>, vector<8x8x32xf32>
    %c0_2 = arith.constant 0 : index
    %c0_3 = arith.constant 0 : index
    %1 = vector.load %arg2[%c0_2, %c0_3] : memref<8x32xf32, #tpu.memory_space<vmem>>, vector<8x32xf32>
    %cst = arith.constant dense<0.000000e+00> : vector<8x32xf32>
    %2 = vector.multi_reduction <add>, %0, %cst [1] : vector<8x8x32xf32> to vector<8x32xf32>
    %cst_4 = arith.constant 8.000000e+00 : f32
    %3 = vector.broadcast %cst_4 : f32 to vector<8x32xf32>
    %4 = arith.divf %2, %3 : vector<8x32xf32>
    %5 = arith.addf %4, %1 : vector<8x32xf32>
    %c0_5 = arith.constant 0 : index
    %c0_6 = arith.constant 0 : index
    %6 = vector.load %arg3[%c0_5, %c0_6] : memref<32x128xf32, #tpu.memory_space<vmem>>, vector<32x128xf32>
    %cst_7 = arith.constant dense<0.000000e+00> : vector<8x128xf32>
    %7 = tpu.matmul %5, %6, %cst_7 {dimension_numbers = #tpu.dot_dimension_numbers<[1], [0], [0], [1], [0, 0, 1, 1], [], []>} : vector<8x32xf32>, vector<32x128xf32>, vector<8x128xf32> -> vector<8x128xf32>
    %c0_8 = arith.constant 0 : index
    %c0_9 = arith.constant 0 : index
    %8 = vector.load %arg4[%c0_8, %c0_9] : memref<1x128xf32, #tpu.memory_space<vmem>>, vector<1x128xf32>
    %9 = vector.broadcast %8 : vector<1x128xf32> to vector<8x128xf32>
    %10 = arith.addf %7, %9 : vector<8x128xf32>
    %c0_10 = arith.constant 0 : index
    %c0_11 = arith.constant 0 : index
    %11 = vector.load %arg7[%c0_10, %c0_11] : memref<8x128xf32, #tpu.memory_space<vmem>>, vector<8x128xf32>
    tpu.vector_store %arg7[%c0_10, %c0_11], %10 {strides = array<i32>} : memref<8x128xf32, #tpu.memory_space<vmem>>, vector<8x128xf32>,
    %12 = vector.shape_cast %0 : vector<8x8x32xf32> to vector<64x32xf32>
    %c0_12 = arith.constant 0 : index
    %c0_13 = arith.constant 0 : index
    %13 = vector.load %arg5[%c0_12, %c0_13] : memref<32x128xf32, #tpu.memory_space<vmem>>, vector<32x128xf32>
    %cst_14 = arith.constant dense<0.000000e+00> : vector<64x128xf32>
    %14 = tpu.matmul %12, %13, %cst_14 {dimension_numbers = #tpu.dot_dimension_numbers<[1], [0], [0], [1], [0, 0, 1, 1], [], []>} : vector<64x32xf32>, vector<32x128xf32>, vector<64x128xf32> -> vector<64x128xf32>
    %c0_15 = arith.constant 0 : index
    %c0_16 = arith.constant 0 : index
    %15 = vector.load %arg6[%c0_15, %c0_16] : memref<1x128xf32, #tpu.memory_space<vmem>>, vector<1x128xf32>
    %16 = vector.broadcast %15 : vector<1x128xf32> to vector<64x128xf32>
    %17 = arith.addf %14, %16 : vector<64x128xf32>
    %c0_17 = arith.constant 0 : index
    %c0_18 = arith.constant 0 : index
    %18 = vector.load %arg8[%c0_17, %c0_18] : memref<64x128xf32, #tpu.memory_space<vmem>>, vector<64x128xf32>
    tpu.vector_store %arg8[%c0_17, %c0_18], %17 {strides = array<i32>} : memref<64x128xf32, #tpu.memory_space<vmem>>, vector<64x128xf32>,
    return
  }
  func.func @transform_0(%arg0: i32) -> (i32, i32, i32) {
    %c0_i32 = arith.constant 0 : i32
    %c0_i32_0 = arith.constant 0 : i32
    %c0_i32_1 = arith.constant 0 : i32
    return %arg0, %c0_i32, %c0_i32_0 : i32, i32, i32
  }
  func.func @transform_1(%arg0: i32) -> (i32, i32) {
    %c0_i32 = arith.constant 0 : i32
    %c0_i32_0 = arith.constant 0 : i32
    return %arg0, %c0_i32 : i32, i32
  }
  func.func @transform_2(%arg0: i32) -> (i32, i32) {
    %c0_i32 = arith.constant 0 : i32
    %c0_i32_0 = arith.constant 0 : i32
    %c0_i32_1 = arith.constant 0 : i32
    return %c0_i32, %c0_i32_0 : i32, i32
  }
  func.func @transform_3(%arg0: i32) -> (i32, i32) {
    %c0_i32 = arith.constant 0 : i32
    %c0_i32_0 = arith.constant 0 : i32
    %c0_i32_1 = arith.constant 0 : i32
    return %c0_i32, %c0_i32_0 : i32, i32
  }
  func.func @transform_4(%arg0: i32) -> (i32, i32) {
    %c0_i32 = arith.constant 0 : i32
    %c0_i32_0 = arith.constant 0 : i32
    %c0_i32_1 = arith.constant 0 : i32
    return %c0_i32, %c0_i32_0 : i32, i32
  }
  func.func @transform_5(%arg0: i32) -> (i32, i32) {
    %c0_i32 = arith.constant 0 : i32
    %c0_i32_0 = arith.constant 0 : i32
    %c0_i32_1 = arith.constant 0 : i32
    return %c0_i32, %c0_i32_0 : i32, i32
  }
  func.func @transform_6(%arg0: i32) -> (i32, i32) {
    %c0_i32 = arith.constant 0 : i32
    %c0_i32_0 = arith.constant 0 : i32
    return %arg0, %c0_i32 : i32, i32
  }
  func.func @transform_7(%arg0: i32) -> (i32, i32) {
    %c0_i32 = arith.constant 0 : i32
    %c0_i32_0 = arith.constant 0 : i32
    return %arg0, %c0_i32 : i32, i32
  }
}

</mosaic_0001>

<bundles_post_ra>
// kernel: model_join_forward.1
= control target key start
LH: loop header
LB: loop body
LE: loop exit
PB: predicated region body
PF: predicated region fallthrough
CT: control target
= control target key end

     0   :  { %13 = vsyncpa [#allocation3], 0  ;;  %s1240_s0 = inlined_call_operand.vmem [shape: f32[16,8,32], index: 0, kind: input, shape index: {}]   ;;  %s1241_s1 = inlined_call_operand.vmem [shape: f32[16,32], index: 1, kind: input, shape index: {}]   ;;  %s1242_s2 = inlined_call_operand.vmem [shape: f32[32,128], index: 2, kind: input, shape index: {}]   ;;  %s1243_s3 = inlined_call_operand.vmem [shape: f32[1,128], index: 3, kind: input, shape index: {}]   ;;  %s1244_s4 = inlined_call_operand.vmem [shape: f32[32,128], index: 4, kind: input, shape index: {}]   ;;  %s1245_s5 = inlined_call_operand.vmem [shape: f32[1,128], index: 5, kind: input, shape index: {}]   ;;  %s1246_s6 = inlined_call_operand.vmem [shape: f32[16,128], index: 6, kind: output, shape index: {0}]   ;;  %s1247_s7 = inlined_call_operand.hbm [shape: f32[128,128], index: 7, kind: output, shape index: {1}]  }
   0x1   :  { %15 = vsyncpa [#allocation3 + $0x1], 0  ;;  %s1033_s24 = smov 0   ;;  %s1035_s25 = smov 0  }
   0x2   :  { %s1037_s26 = smov 0   ;;  %s1039_s27 = smov 0  }
   0x3 LB: > { %s1054_s28 = sadd.s32 4294967295, %s985_s27   ;;  %s787_s29 = sadd.s32 4294967294, %s985_s27   ;;  %s985_s27 = sphi %s1039_s27, %s1253_s27   ;;  %s981_s26 = sphi %s1037_s26, %s1252_s26   ;;  %s977_s25 = sphi %s1035_s25, %s1251_s25   ;;  %s973_s24 = sphi %s1033_s24, %s1250_s24  }
   0x4   : > { %s1058_s30 = sadd.s32 1, %s985_s27   ;;  %s190_s8 = sadd.s32 1, %s981_s26 }
   0x5   : > { %s187_s9 = ssub.s32 %s985_s27, %s1058_s30  ;;  %p200_p0 = scmp.ne.s32.totalorder %s981_s26, %s977_s25 }
   0x6   : > { %p188_p1 = scmp.eq.s32.totalorder %s187_s9, 0  ;;  %p201_p2 = scmp.eq.s32.totalorder %s1054_s28, 1 }
   0x7   : > { %p206_p3 = scmp.ne.s32.totalorder %s977_s25, %s973_s24  ;;  %p207_p4 = scmp.eq.s32.totalorder %s787_s29, 1 }
   0x8   : > { %s1069_s10 = scalar_select %p188_p1, %s981_s26, %s190_s8  }
   0x9   : > { %p1071_p5 = por %p201_p2, %p200_p0  ;;  %p1075_p6 = por %p207_p4, %p206_p3 }
   0xa   : > { %p790_p7 = scmp.ge.s32.totalorder %s985_s27, 1  ;;  %p253_p8 = scmp.lt.s32.totalorder %s985_s27, 3 }
   0xc   : > { %p254_p9 = pnand %p790_p7, %p253_p8 }
   0xd   : > { %v520_v0 = vld [vmem:[%s1244_s4] sm:$0xff] (!%p254_p9)  ;;  %v521_v1 = vld [vmem:[%s1244_s4 + $0x8] sm:$0xff] (!%p254_p9)  ;;  %s792_s19 = sshll.u32 (!%p254_p9), %s1054_s28, 3  ;;  %p299_p10 = scmp.lt.s32.totalorder (!%p254_p9), %s1054_s28, 1  ;;  %v987_v4 = vmov (!%p254_p9), 0.0|0.0   ;;  %v522_v6 = vld [vmem:[%s1244_s4 + $0x10] sm:$0xff] (!%p254_p9) }
   0xe   : > { %257 = sbr.rel (%p254_p9) target bundleno = 291 (0x123), region = 44  ;;  %v407_v2 = vld [vmem:[%s1242_s2] sm:$0xff] (!%p254_p9)  ;;  %v1092_v3 = vpack.c.bf16 (!%p254_p9), %v521_v1, %v520_v0  ;;  %861 = vmatprep.subr.bf16.mxu0 (!%p254_p9), %v987_v4  ;;  %v408_v5 = vld [vmem:[%s1242_s2 + $0x8] sm:$0xff] (!%p254_p9)  ;;  %v523_v7 = vld [vmem:[%s1244_s4 + $0x18] sm:$0xff] (!%p254_p9)  ;;  %p294_p11 = scmp.lt.s32.totalorder (!%p254_p9), %s792_s19, 15  ;;  %vm317_vm0 = vcmask (!%p254_p9), 261120  }
   0xf   : > { %v862_v8 = vpack.c.bf16 (!%p254_p9), %v408_v5, %v407_v2  ;;  %v1103_v9 = vpack.c.bf16 (!%p254_p9), %v523_v7, %v522_v6  ;;  %v409_v10 = vld [vmem:[%s1242_s2 + $0x10] sm:$0xff] (!%p254_p9)  ;;  %v410_v11 = vld [vmem:[%s1242_s2 + $0x18] sm:$0xff] (!%p254_p9)  ;;  %vm988_vm1 = vmmov (!%p254_p9), 0   ;;  %v989_v14 = vmov (!%p254_p9), 0.0   ;;  %s812_s29 = sshll.u32 (!%p254_p9), %s1054_s28, 10 }
  0x10   : > { %875 = vmatprep.subr.bf16.mxu1 (!%p254_p9), %v1092_v3  ;;  %v865_v12 = vpack.c.bf16 (!%p254_p9), %v410_v11, %v409_v10  ;;  %838 = vmatprep.mubr.msk.f32.mxu0 (!%p254_p9), %vm988_vm1, %v989_v14  ;;  %vm427_vm2 = vcmask (!%p254_p9), 1041409   ;;  %vm430_vm3 = vcmask (!%p254_p9), 1042434   ;;  %vm433_vm4 = vcmask (!%p254_p9), 1043459   ;;  %s1193_s14 = scalar_lea.hbm (!%p254_p9), %s1247_s7, %s812_s29 }
  0x11   : > { %877 = vmatpush3.bf16.msra.mxu1 (!%p254_p9), %v1092_v3  ;;  %863 = vmatpush3.bf16.msra.mxu0 (!%p254_p9), %v862_v8  ;;  %vm436_vm5 = vcmask (!%p254_p9), 1044484   ;;  %vm439_vm6 = vcmask (!%p254_p9), 1045509   ;;  %vm442_vm7 = vcmask (!%p254_p9), 1046534   ;;  %vm445_vm8 = vcmask (!%p254_p9), 1047559  }
  0x12   : > { %876 = vmatprep.subr.bf16.mxu1 (!%p254_p9), %v1103_v9  ;;  %864 = vmatprep.subr.bf16.mxu0 (!%p254_p9), %v987_v4 }
  0x15   : > { %s1112_s16 = scalar_select %p299_p10, %s1054_s28, 1  ;;  %878 = vmatpush3.bf16.msra.mxu1 %v1103_v9  ;;  %866 = vmatpush3.bf16.msra.mxu0 %v865_v12 }
  0x16   : > { %s1255_s19 = smov (!%p294_p11, %s792_s19), 15  ;;  %868 = vmatprep.subr.bf16.mxu0 %v1092_v3 }
  0x17   : > { %s794_s17 = sshll.u32 %s1112_s16, 3  ;;  %s793_s18 = sshll.u32 %s1255_s19, 3 }
  0x18   : > { %s302_s22 = scalar_lea.vmem %s1241_s1, %s794_s17  ;;  %s297_s8 = scalar_lea.vmem %s1240_s0, %s793_s18 }
  0x19   : > { %v1126_v13 = vld [vmem:[%s302_s22] sm:$0xff]  ;;  %v1130_v16 = vld [vmem:[%s297_s8 + $0x8] sm:$0xff]  ;;  %v310_v17 = vld [vmem:[%s297_s8 + $0x10] sm:$0xff]  ;;  %s290_s19 = sand.u32 1, %s977_s25   ;;  %s306_s23 = scalar_lea.vmem %s1246_s6, %s794_s17 }
  0x1a   : > { %v1128_v15 = vld [vmem:[%s297_s8] sm:$0xff]  ;;  %v384_v18 = vrot.slane %v1126_v13, 1  ;;  %v385_v19 = vrot.slane %v1126_v13, 2  ;;  %v386_v20 = vrot.slane %v1126_v13, 3  ;;  %v325_v22 = vsel %vm317_vm0, %v1130_v16, 0.0  ;;  %v311_v24 = vld [vmem:[%s297_s8 + $0x18] sm:$0xff]  ;;  %852 = vmatprep.mubr.msk.f32.mxu1 %vm317_vm0, %v310_v17 }
  0x1b   : > { %v318_v21 = vsel %vm317_vm0, %v1128_v15, 0.0  ;;  %v332_v23 = vsel %vm317_vm0, %v310_v17, 0.0  ;;  %v312_v25 = vld [vmem:[%s297_s8 + $0x20] sm:$0xff]  ;;  %v313_v26 = vld [vmem:[%s297_s8 + $0x28] sm:$0xff]  ;;  %v326_v28 = vrot.slane %v325_v22, 4  ;;  %v339_v30 = vsel %vm317_vm0, %v311_v24, 0.0  ;;  %853 = vmatmul.mubr.msk.f32.vlgmr.msra.gmra.mrb[0].mxu1 %vm317_vm0, %v311_v24 }
  0x1c   : > { %v319_v27 = vrot.slane %v318_v21, 4  ;;  %v333_v29 = vrot.slane %v332_v23, 4  ;;  %v314_v31 = vld [vmem:[%s297_s8 + $0x30] sm:$0xff]  ;;  %v315_v32 = vld [vmem:[%s297_s8 + $0x38] sm:$0xff]  ;;  %v340_v33 = vrot.slane %v339_v30, 4  ;;  %v346_v34 = vsel %vm317_vm0, %v312_v25, 0.0  ;;  %855 = vmatprep.mubr.msk.f32.mxu1 %vm317_vm0, %v312_v25 }
  0x1d   : > { %v353_v35 = vsel %vm317_vm0, %v313_v26, 0.0  ;;  %v360_v36 = vsel %vm317_vm0, %v314_v31, 0.0  ;;  %v327_v38 = vadd.f32 %v326_v28, %v325_v22  ;;  %v347_v40 = vrot.slane %v346_v34, 4  ;;  %s791_s9 = sshll.u32 %s290_s19, 6  ;;  %s1199_s16 = scalar_lea.sflag [#allocation3], %s290_s19 }
  0x1e   : > { %v320_v37 = vadd.f32 %v319_v27, %v318_v21  ;;  %v334_v39 = vadd.f32 %v333_v29, %v332_v23  ;;  %v341_v41 = vadd.f32 %v340_v33, %v339_v30  ;;  %v354_v42 = vrot.slane %v353_v35, 4  ;;  %s292_s15 = scalar_lea.vmem [#allocation2], %s791_s9  ;;  %s990_s17 = smov [#allocation2]  }
  0x1f   : > { %v361_v43 = vrot.slane %v360_v36, 4  ;;  %v367_v44 = vsel %vm317_vm0, %v315_v32, 0.0  ;;  %v328_v46 = vrot.slane %v327_v38, 2  ;;  %v348_v48 = vadd.f32 %v347_v40, %v346_v34  ;;  %856 = vmatmul.mubr.msk.f32.gmra.mrb[2].mxu1 %vm317_vm0, %v313_v26  ;;  %s689_s8 = sshll.u32 %s292_s15, 4  ;;  %s927_s18 = sshll.u32 %s990_s17, 4  ;;  %s1195_s8 = int_to_ptr.vmem [resolvable:$true] %s689_s8  ;;  %s928_s18 = int_to_ptr.vmem [resolvable:$false] %s927_s18 }
  0x20   : > { %v321_v45 = vrot.slane %v320_v37, 2  ;;  %v335_v47 = vrot.slane %v334_v39, 2  ;;  %v342_v49 = vrot.slane %v341_v41, 2  ;;  %v355_v50 = vadd.f32 %v354_v42, %v353_v35  ;;  %858 = vmatprep.mubr.msk.f32.mxu1 %vm317_vm0, %v314_v31  ;;  %s923_s28 = scalar_lea.vmem %s1195_s8, 1024  ;;  %s929_s20 = scalar_lea.vmem %s928_s18, 2048 }
  0x21   : > { %v362_v51 = vadd.f32 %v361_v43, %v360_v36  ;;  %v368_v52 = vrot.slane %v367_v44, 4  ;;  %v329_v54 = vadd.f32 %v328_v46, %v327_v38  ;;  %v349_v56 = vrot.slane %v348_v48, 2  ;;  %p924_p12 = scmp.ne.s32.totalorder %s1195_s8, %s923_s28  ;;  %p930_p1 = scmp.lt.s32.totalorder %s1195_s8, %s928_s18 }
  0x22   : > { %v322_v53 = vadd.f32 %v321_v45, %v320_v37  ;;  %v336_v55 = vadd.f32 %v335_v47, %v334_v39  ;;  %v343_v57 = vadd.f32 %v342_v49, %v341_v41  ;;  %v356_v58 = vrot.slane %v355_v50, 2  ;;  %p931_p2 = scmp.lt.s32.totalorder %s929_s20, %s923_s28 }
  0x23   : > { %v363_v59 = vrot.slane %v362_v51, 2  ;;  %v369_v60 = vadd.f32 %v368_v52, %v367_v44  ;;  %v330_v62 = vrot.slane %v329_v54, 1  ;;  %v350_v0 = vadd.f32 %v349_v56, %v348_v48  ;;  %859 = vmatmul.mubr.msk.f32.gmra.mrb[4].mxu1 %vm317_vm0, %v315_v32  ;;  %v798_v56 = vld [vmem:[%s1245_s5] ss:$0 sm:$0xff]  ;;  %p925_p13 = pnand %p924_p12, %p1071_p5 }
  0x24   : > { %v323_v61 = vrot.slane %v322_v53, 1  ;;  %v337_v63 = vrot.slane %v336_v55, 1  ;;  %v344_v1 = vrot.slane %v343_v57, 1  ;;  %v357_v2 = vadd.f32 %v356_v58, %v355_v50  ;;  %p932_p3 = por %p931_p2, %p930_p1 }
  0x25   : > { %v364_v4 = vadd.f32 %v363_v59, %v362_v51  ;;  %v370_v5 = vrot.slane %v369_v60, 2  ;;  %v331_v7 = vadd.f32 %v330_v62, %v329_v54  ;;  %v351_v10 = vrot.slane %v350_v0, 1  ;;  %p926_p0 = pneg %p925_p13 }
  0x26   : > { %v324_v6 = vadd.f32 %v323_v61, %v322_v53  ;;  %v338_v8 = vadd.f32 %v337_v63, %v336_v55  ;;  %v345_v11 = vadd.f32 %v344_v1, %v343_v57  ;;  %v358_v12 = vrot.slane %v357_v2, 1  ;;  %v796_v1 = vld [vmem:[%s1243_s3] ss:$0 sm:$0xff] }
  0x27   : > { %v365_v14 = vrot.slane %v364_v4, 1  ;;  %v371_v17 = vadd.f32 %v370_v5, %v369_v60  ;;  %v376_v22 = vmul.f32 0.125, %v331_v7  ;;  %v352_v24 = vadd.f32 %v351_v10, %v350_v0  ;;  %p933_p4 = pnand %p932_p3, %p926_p0 }
  0x28   : > { %v375_v21 = vmul.f32 0.125, %v324_v6  ;;  %v377_v23 = vmul.f32 0.125, %v338_v8  ;;  %v378_v25 = vmul.f32 0.125, %v345_v11  ;;  %v359_v26 = vadd.f32 %v358_v12, %v357_v2 }
  0x29   : > { %v366_v27 = vadd.f32 %v365_v14, %v364_v4  ;;  %v372_v28 = vrot.slane %v371_v17, 1  ;;  %v400_v30 = vadd.f32 %v384_v18, %v376_v22  ;;  %v379_v32 = vmul.f32 0.125, %v352_v24 }
  0x2a   : > { %v399_v29 = vadd.f32 %v375_v21, %v1126_v13  ;;  %v401_v31 = vadd.f32 %v385_v19, %v377_v23  ;;  %v402_v33 = vadd.f32 %v386_v20, %v378_v25  ;;  %v380_v35 = vmul.f32 0.125, %v359_v26 }
  0x2b   : > { %v373_v34 = vadd.f32 %v372_v28, %v371_v17  ;;  %v381_v36 = vmul.f32 0.125, %v366_v27  ;;  %v426_v37 = vrot.slane %v400_v30, 7  ;;  %v387_v39 = vrot.slane %v1126_v13, 4 }
  0x2c   : > { %v429_v38 = vrot.slane %v401_v31, 6  ;;  %v388_v40 = vrot.slane %v1126_v13, 5  ;;  %v432_v41 = vrot.slane %v402_v33, 5  ;;  %v389_v18 = vrot.slane %v1126_v13, 6 }
  0x2d   : > { %v382_v42 = vmul.f32 0.125, %v373_v34  ;;  %v390_v43 = vrot.slane %v1126_v13, 7  ;;  %v428_v19 = vsel %vm427_vm2, %v426_v37, %v399_v29  ;;  %v403_v44 = vadd.f32 %v387_v39, %v379_v32 }
  0x2e   : > { %v404_v45 = vadd.f32 %v388_v40, %v380_v35  ;;  %v431_v20 = vsel %vm430_vm3, %v429_v38, %v428_v19  ;;  %v405_v46 = vadd.f32 %v389_v18, %v381_v36 }
  0x2f   : > { %v406_v47 = vadd.f32 %v390_v43, %v382_v42  ;;  %v434_v48 = vsel %vm433_vm4, %v432_v41, %v431_v20  ;;  %v435_v49 = vrot.slane %v403_v44, 4 }
  0x30   : > { %v438_v50 = vrot.slane %v404_v45, 3  ;;  %v441_v51 = vrot.slane %v405_v46, 2 }
  0x31   : > { %v444_v52 = vrot.slane %v406_v47, 1  ;;  %v437_v13 = vsel %vm436_vm5, %v435_v49, %v434_v48 }
  0x32   : > { %v440_v53 = vsel %vm439_vm6, %v438_v50, %v437_v13 }
  0x33   : > { %v443_v54 = vsel %vm442_vm7, %v441_v51, %v440_v53 }
  0x34   : > { %v446_v55 = vsel %vm445_vm8, %v444_v52, %v443_v54 }
  0x35   : > { %839 = vmatmul.mubr.msk.f32.vlgmr.msra.gmra.mrb[0].mxu0 %vm317_vm0, %v446_v55 }
  0x36   : > { %870 = vmatpush3.bf16.msra.mxu0 %v1092_v3  ;;  %849 = vmatprep.mubr.msk.f32.mxu0 %vm317_vm0, %v1128_v15 }
  0x37   : > { %872 = vmatprep.subr.bf16.mxu0 %v1103_v9 }
  0x3a   : > { %874 = vmatpush3.bf16.msra.mxu0 %v1103_v9 }
  0x3d   : > { %850 = vmatmul.mubr.msk.f32.vlgmr.msra.gmra.mrb[2].mxu0 %vm317_vm0, %v1130_v16 }
  0xee   : > { %v854_v57 = vpop.f32.mrb[0].mxu1 }
  0xef   : > { %v637_v58 = vadd.f32 %v854_v57, %v798_v56  ;;  %v631_v3 = vpop.f32.mrb[1].mxu1 }
  0xf0   : > { %v632_v59 = vadd.f32 %v798_v56, %v631_v3 }
  0xf1   : > { %663 = vst [vmem:[%s292_s15 + $0x18] sm:$0xff] %v637_v58 }
  0xf2   : > { %662 = vst [vmem:[%s292_s15 + $0x10] sm:$0xff] %v632_v59  ;;  %v857_v15 = vpop.f32.mrb[2].mxu1 }
  0xf3   : > { %v647_v9 = vadd.f32 %v857_v15, %v798_v56  ;;  %v641_v60 = vpop.f32.mrb[3].mxu1 }
  0xf4   : > { %v642_v16 = vadd.f32 %v798_v56, %v641_v60 }
  0xf5   : > { %665 = vst [vmem:[%s292_s15 + $0x28] sm:$0xff] %v647_v9 }
  0xf6   : > { %664 = vst [vmem:[%s292_s15 + $0x20] sm:$0xff] %v642_v16  ;;  %v860_v61 = vpop.f32.mrb[4].mxu1 }
  0xf7   : > { %v657_v62 = vadd.f32 %v860_v61, %v798_v56  ;;  %v651_v63 = vpop.f32.mrb[5].mxu1 }
  0xf8   : > { %v652_v0 = vadd.f32 %v798_v56, %v651_v63 }
  0xf9   : > { %667 = vst [vmem:[%s292_s15 + $0x38] sm:$0xff] %v657_v62 }
  0xfa   : > { %666 = vst [vmem:[%s292_s15 + $0x30] sm:$0xff] %v652_v0 }
 0x108   : > { %v515_v2 = vpop.f32.mrb[0].mxu0 }
 0x109   : > { %v516_v4 = vadd.f32 %v796_v1, %v515_v2  ;;  %v840_v5 = vpop.f32.mrb[1].mxu0 }
 0x10b   : > { %519 = vst [vmem:[%s306_s23] sm:$0xff] %v516_v4 }
 0x110   : > { %v851_v6 = vpop.f32.mrb[2].mxu0 }
 0x111   : > { %v627_v7 = vadd.f32 %v851_v6, %v798_v56  ;;  %v621_v8 = vpop.f32.mrb[3].mxu0 }
 0x112   : > { %v622_v10 = vadd.f32 %v798_v56, %v621_v8 }
 0x113   : > { %661 = vst [vmem:[%s292_s15 + $0x8] sm:$0xff] %v627_v7 }
 0x114   : > { %660 = vst [vmem:[%s292_s15] sm:$0xff] %v622_v10 }
 0x115   : > { %936 = shalt.err (!%p933_p4)
}
 0x116   : > { %s937_s19 = scalar_lea.hbm %s1193_s14, 1024  ;;  %s941_s22 = scalar_lea.hbm %s1247_s7, 2048 }
 0x117   : > { %p938_p7 = scmp.ne.s32.totalorder %s1193_s14, %s937_s19  ;;  %p942_p10 = scmp.lt.u32.totalorder %s1193_s14, %s1247_s7 }
 0x118   : > { %p943_p11 = scmp.lt.u32.totalorder %s941_s22, %s937_s19  ;;  %p945_p13 = scmp.lt.u32.totalorder %s937_s19, %s1193_s14 }
 0x119   : > { %p939_p8 = pnand %p938_p7, %p1071_p5 }
 0x11a   : > { %p944_p12 = por %p943_p11, %p942_p10 }
 0x11b   : > { %p940_p9 = pneg %p939_p8 }
 0x11c   : > { %p946_p0 = por %p945_p13, %p944_p12 }
 0x11e   : > { %p947_p1 = pnand %p946_p0, %p940_p9 }
 0x120   : > { %950 = shalt.err (!%p947_p1)
}
 0x121   : > { %s991_s9 = smov 128   ;;  %s992_s13 = smov 8  }
 0x122   : > { %879 = dma.vmem_to_hbm [thread:$0]  (%p1071_p5), %s1195_s8, 1024, %s1193_s14, %s1199_s16, %s991_s9, %s991_s9, %s992_s13  }
 0x123 PF: > { %p885_p2 = scmp.ge.s32.totalorder %s985_s27, 2  ;;  %s711_s28 = sand.u32 1, %s973_s24  }
 0x124   : > { %s712_s17 = scalar_lea.sflag [#allocation3], %s711_s28 }
 0x125   : > { %p882_p3 = pnand %p885_p2, %p1075_p6 }
 0x127   : > { %968 = dma.done.wait (!%p882_p3), %s712_s17, 1024  }
 0x128   : > { %970 = vsyncadd (!%p882_p3), %s712_s17, 4294966272  ;;  %p18_p4 = scmp.ge.s32.totalorder %s1058_s30, 4   ;;  %s1250_s24 = smov %s977_s25 }
 0x129   : > { %s1251_s25 = smov %s981_s26  ;;  %s1252_s26 = smov %s1069_s10 }
 0x12a   : > { %s1253_s27 = smov %s1058_s30  ;;  %20 = sbr.rel (!%p18_p4) target bundleno = 3 (0x3), region = 94 }
 0x131   :  { %717 = vsyncpa [#allocation3], 1 }
 0x132   :  { %719 = vsyncpa [#allocation3 + $0x1], 1 }

</bundles_post_ra>
